<compile_context>
chip_gen: v5e
topology: v5e:2x2
jax: 0.10.0
libtpu: 0.0.40
codegen_flags: <defaults>
</compile_context>

<pallas_src>
import functools

import jax
import jax.numpy as jnp
from jax import lax
from jax.experimental import pallas as pl
from jax.experimental.pallas import tpu as pltpu


def _sdpa_kernel(*refs, scale, has_mask, has_lens, return_attn, recip_approx):
    it = iter(refs)
    lens_ref = next(it) if has_lens else None       # (B,) int32, SMEM (prefetch)
    q_ref = next(it)                                # (1, TQ, D)
    k_ref = next(it)                                # (1, Lk, D)
    v_ref = next(it)                                # (1, Lk, Dv)
    mask_ref = next(it) if has_mask else None       # (1, TQ, Lk) int8
    out_ref = next(it)                              # (1, TQ, Dv)
    attn_ref = next(it) if return_attn else None    # (1, TQ, Lk)

    q = q_ref[0]                                    # (TQ, D)
    k = k_ref[0]                                    # (Lk, D)
    v = v_ref[0]                                    # (Lk, Dv)

    inv_scale = 1.0 / scale
    if q.dtype == jnp.float32:
        # Exact in f32: fold 1/scale into q (O(TQ*D) VPU work, not O(TQ*Lk)).
        q = q * jnp.float32(inv_scale)
        scale_scores = False
    else:
        # Low-precision inputs: keep the scaling in f32 on the scores so no
        # extra rounding is introduced before the MXU.
        scale_scores = True

    # scores = q @ k^T expressed as a contraction over the D axes of both
    # operands -- no explicit transpose / XLU relayout.  Sub-f32 operands run
    # at the MXU's native rate; accumulation is always f32.
    s = lax.dot_general(
        q, k,
        dimension_numbers=(((1,), (1,)), ((), ())),
        preferred_element_type=jnp.float32,
    )                                               # (TQ, Lk) f32
    if scale_scores:
        s = s * jnp.float32(inv_scale)

    if has_mask:
        # Matches torch `attention[mask] = -inf`.  A fully-masked row yields
        # NaN after softmax, exactly like the PyTorch module.
        s = jnp.where(mask_ref[0] != 0, -jnp.inf, s)
    if has_lens:
        b = pl.program_id(0)
        kpos = lax.broadcasted_iota(jnp.int32, s.shape, 1)
        s = jnp.where(kpos >= lens_ref[b], -jnp.inf, s)

    # Numerically stable softmax over the key axis (f32 math).
    s_max = jnp.max(s, axis=-1, keepdims=True)
    p = jnp.exp(s - s_max)
    denom = jnp.sum(p, axis=-1, keepdims=True)
    # One reciprocal per row + broadcast multiply.  approx=True (EUP vrcp,
    # effectively free) is used only when precision is already sub-f32.
    attn = p * pl.reciprocal(denom, approx=recip_approx)

    # TODO(synk): nn.Dropout(0.1) omitted (eval-mode identity); training-mode
    # dropout would use pltpu.prng_seed / prng_random_bits but cannot bit-match
    # torch's RNG anyway.

    out = lax.dot_general(
        attn.astype(v.dtype), v,
        dimension_numbers=(((1,), (0,)), ((), ())),
        preferred_element_type=jnp.float32,
    )                                               # (TQ, Dv) f32 accumulate

    out_ref[0] = out.astype(out_ref.dtype)
    if return_attn:
        attn_ref[0] = attn.astype(attn_ref.dtype)


def _vmem_capacity_bytes():
    """Per-core VMEM capacity; conservative v7x (64 MiB) fallback."""
    try:
        info = pltpu.get_tpu_info()
        cap = getattr(info, "vmem_capacity_bytes", None)
        if cap:
            return int(cap)
    except Exception:
        pass
    return 64 << 20


def scaled_dot_product_attention(q, k, v, scale, mask=None, key_lens=None, *,
                                 return_attn=True, matmul_dtype=None):
    """q: [B, Lq, D], k: [B, Lk, D], v: [B, Lk, Dv].

    mask:     optional [B, Lq, Lk] (bool / int, nonzero == masked -> -inf),
              exactly like the PyTorch module.
    key_lens: optional [B] int32 key-padding lengths; key positions >= len are
              masked.  Preferred for FastSpeech2 padding masks: the mask is
              built in-kernel from scalar-prefetched lengths, removing the
              whole B*Lq*Lk dense-mask HBM stream.
    matmul_dtype: optional MXU compute dtype (e.g. jnp.bfloat16).  Inputs are
              cast in the wrapper (halving K/V DMA + VMEM residency); the
              accumulation stays f32 and outputs keep the original dtype.

    Returns (output, attention) like the PyTorch module; attention is None when
    return_attn=False (saves the O(B*Lq*Lk) HBM writeback).
    """
    B, Lq, D = q.shape
    _, Lk, _ = k.shape
    Dv = v.shape[-1]
    orig_dtype = q.dtype
    has_mask = mask is not None
    has_lens = key_lens is not None

    if matmul_dtype is not None and jnp.dtype(matmul_dtype) != q.dtype:
        q = q.astype(matmul_dtype)
        k = k.astype(matmul_dtype)
        v = v.astype(matmul_dtype)
    itemsize = jnp.dtype(q.dtype).itemsize
    out_itemsize = jnp.dtype(orig_dtype).itemsize

    # --- query-tile selection: fill the 256-wide v6e/v7x MXU with TQ=256, but
    # when B == 1 and Lq <= 256 keep TQ=128 so dual-TC parts (v7x) get >= 2
    # grid steps; shrink TQ if the per-step footprint would overflow VMEM.
    if Lq <= 128:
        TQ = Lq
    elif Lq <= 256:
        TQ = 128 if B == 1 else Lq
    else:
        TQ = 256

    def _step_bytes(tq):
        blocks = 2 * (  # double-buffered pipeline copies of each block
            tq * D * itemsize
            + Lk * D * itemsize
            + Lk * Dv * itemsize
            + (tq * Lk if has_mask else 0)
            + tq * Dv * out_itemsize
            + (tq * Lk * out_itemsize if return_attn else 0)
        )
        intermediates = 4 * tq * Lk * 4 + 2 * tq * Dv * 4  # f32 score/prob slabs
        return blocks + intermediates

    vmem_cap = _vmem_capacity_bytes()
    if Lq > 256:
        while TQ > 128 and _step_bytes(TQ) > int(vmem_cap * 0.70):
            TQ //= 2
    # TODO(synk): for very long Lk with return_attn=False, add a third
    # ("arbitrary") grid axis over Lk with online-softmax accumulators to bound
    # the (TQ, Lk) slabs on 64 MiB-VMEM parts; unnecessary at FastSpeech2 sizes.

    grid = (B, pl.cdiv(Lq, TQ))

    # index_maps: with scalar prefetch the lengths ref arrives as a trailing arg.
    if has_lens:
        q_im = lambda b, qi, lens: (b, qi, 0)
        kv_im = lambda b, qi, lens: (b, 0, 0)
        o_im = lambda b, qi, lens: (b, qi, 0)
    else:
        q_im = lambda b, qi: (b, qi, 0)
        kv_im = lambda b, qi: (b, 0, 0)
        o_im = lambda b, qi: (b, qi, 0)

    in_specs = [
        pl.BlockSpec((1, TQ, D), q_im),
        pl.BlockSpec((1, Lk, D), kv_im),
        pl.BlockSpec((1, Lk, Dv), kv_im),
    ]
    inputs = [q, k, v]
    if has_mask:
        # 1-byte wire format either way; only cast when the caller's dtype is
        # not already 8-bit (no extra copy for pre-quantized masks).
        m = mask if mask.dtype == jnp.int8 else mask.astype(jnp.int8)
        in_specs.append(pl.BlockSpec((1, TQ, Lk), q_im))
        inputs.append(m)

    out_shapes = [jax.ShapeDtypeStruct((B, Lq, Dv), orig_dtype)]
    out_specs = [pl.BlockSpec((1, TQ, Dv), o_im)]
    if return_attn:
        out_shapes.append(jax.ShapeDtypeStruct((B, Lq, Lk), orig_dtype))
        out_specs.append(pl.BlockSpec((1, TQ, Lk), o_im))

    # Advisory cost estimate so XLA schedules neighbors around the custom call.
    bytes_accessed = (
        B * Lq * D * itemsize
        + B * Lk * D * itemsize
        + B * Lk * Dv * itemsize
        + (B * Lq * Lk if has_mask else 0)
        + (B * 4 if has_lens else 0)
        + B * Lq * Dv * out_itemsize
        + (B * Lq * Lk * out_itemsize if return_attn else 0)
    )
    cost = pl.CostEstimate(
        flops=2 * B * Lq * Lk * (D + Dv),
        transcendentals=B * Lq * Lk,
        bytes_accessed=bytes_accessed,
    )

    # VMEM budget derived from the actual footprint + device capacity
    # (no hard 48 MiB clamp; ~46 MiB ceiling on 64 MiB parts, ~92 MiB on 128 MiB).
    needed = _step_bytes(TQ) + (2 << 20)
    ceiling = max(int(vmem_cap * 0.72), 32 << 20)
    vmem_limit = int(min(max(needed, 32 << 20), ceiling))

    recip_approx = bool(itemsize < 4 or out_itemsize < 4)

    kernel = functools.partial(
        _sdpa_kernel, scale=float(scale), has_mask=has_mask, has_lens=has_lens,
        return_attn=return_attn, recip_approx=recip_approx,
    )

    call_args = ([key_lens.astype(jnp.int32)] if has_lens else []) + inputs

    results = pl.pallas_call(
        kernel,
        out_shape=tuple(out_shapes),
        grid_spec=pltpu.PrefetchScalarGridSpec(
            num_scalar_prefetch=1 if has_lens else 0,
            grid=grid,
            in_specs=in_specs,
            out_specs=out_specs,
        ),
        compiler_params=pltpu.CompilerParams(
            dimension_semantics=("parallel", "parallel"),
            vmem_limit_bytes=vmem_limit,
        ),
        cost_estimate=cost,
    )(*call_args)

    if return_attn:
        out, attn = results
        return out, attn
    (out,) = results
    return out, None


def _reference(q, k, v, scale, mask=None):
    s = jnp.einsum("bqd,bkd->bqk", q, k) / scale
    if mask is not None:
        s = jnp.where(mask, -jnp.inf, s)
    attn = jax.nn.softmax(s, axis=-1)
    out = jnp.einsum("bqk,bkd->bqd", attn, v)
    return out, attn


if __name__ == "__main__":
    key = jax.random.PRNGKey(0)
    kq, kk, kv = jax.random.split(key, 3)

    B, Lq, Lk, D, Dv = 2, 8, 8, 32, 32
    scale = float(D) ** 0.5  # typical sqrt(d_k) scale passed at construction

    q = jax.random.normal(kq, (B, Lq, D), dtype=jnp.float32)
    k = jax.random.normal(kk, (B, Lk, D), dtype=jnp.float32)
    v = jax.random.normal(kv, (B, Lk, Dv), dtype=jnp.float32)
    # deterministic dense mask: mask out last two key positions for every query
    mask = jnp.zeros((B, Lq, Lk), dtype=bool).at[:, :, -2:].set(True)

    out, attn = scaled_dot_product_attention(q, k, v, scale, mask)
    out = jax.block_until_ready(out)
    attn = jax.block_until_ready(attn)
    out_ref, attn_ref = _reference(q, k, v, scale, mask)
    assert jnp.allclose(out, out_ref, atol=1e-5, rtol=1e-5), "output mismatch"
    assert jnp.allclose(attn, attn_ref, atol=1e-5, rtol=1e-5), "attention mismatch"

    # mask=None path (specialized: no mask DMA, no where)
    out2, attn2 = scaled_dot_product_attention(q, k, v, scale, None)
    jax.block_until_ready(out2)
    out2_ref, attn2_ref = _reference(q, k, v, scale, None)
    assert jnp.allclose(out2, out2_ref, atol=1e-5, rtol=1e-5)
    assert jnp.allclose(attn2, attn2_ref, atol=1e-5, rtol=1e-5)

    # return_attn=False fast path (drops the O(B*Lq*Lk) writeback)
    out3, attn3 = scaled_dot_product_attention(q, k, v, scale, mask, return_attn=False)
    jax.block_until_ready(out3)
    assert attn3 is None
    assert jnp.allclose(out3, out_ref, atol=1e-5, rtol=1e-5)

    # key-padding lengths via scalar prefetch (no dense-mask HBM stream), on a
    # shape that exercises query tiling (Lq > 256 -> TQ = 256, 2 query tiles).
    B2, Lq2, Lk2 = 2, 320, 64
    q2 = jax.random.normal(jax.random.fold_in(kq, 1), (B2, Lq2, D), jnp.float32)
    k2 = jax.random.normal(jax.random.fold_in(kk, 1), (B2, Lk2, D), jnp.float32)
    v2 = jax.random.normal(jax.random.fold_in(kv, 1), (B2, Lk2, Dv), jnp.float32)
    lens = jnp.array([64, 40], dtype=jnp.int32)
    out4, attn4 = scaled_dot_product_attention(q2, k2, v2, scale, key_lens=lens)
    jax.block_until_ready(out4)
    pad_mask = jnp.arange(Lk2)[None, None, :] >= lens[:, None, None]
    out4_ref, attn4_ref = _reference(q2, k2, v2, scale, pad_mask)
    assert jnp.allclose(out4, out4_ref, atol=1e-5, rtol=1e-5)
    assert jnp.allclose(attn4, attn4_ref, atol=1e-5, rtol=1e-5)

    # bf16-fed MXU path (f32 accumulation, outputs stay f32): loose tolerance.
    out5, _ = scaled_dot_product_attention(q, k, v, scale, mask,
                                           matmul_dtype=jnp.bfloat16)
    jax.block_until_ready(out5)
    assert jnp.allclose(out5, out_ref, atol=5e-2, rtol=5e-2)

    print("KERNEL_OK")
</pallas_src>

<mosaic_0001>
module attributes {stable_mosaic.version = 11 : i64} {
  func.func @_sdpa_kernel(%arg0: i32, %arg1: i32, %arg2: memref<1x8x32xf32, #tpu.memory_space<vmem>>, %arg3: memref<1x8x32xf32, #tpu.memory_space<vmem>>, %arg4: memref<1x8x32xf32, #tpu.memory_space<vmem>>, %arg5: memref<1x8x8xi8, #tpu.memory_space<vmem>>, %arg6: memref<1x8x32xf32, #tpu.memory_space<vmem>>, %arg7: memref<1x8x8xf32, #tpu.memory_space<vmem>>) attributes {dimension_semantics = [#tpu.dimension_semantics<parallel>, #tpu.dimension_semantics<parallel>], iteration_bounds = array<i64: 2, 1>, scalar_prefetch = 0 : i64, scratch_operands = 0 : i64, tpu.core_type = #tpu.core_type<tc>, window_params = [{transform_indices = @transform_0, window_bounds = array<i64: 1, 8, 32>}, {transform_indices = @transform_1, window_bounds = array<i64: 1, 8, 32>}, {transform_indices = @transform_2, window_bounds = array<i64: 1, 8, 32>}, {transform_indices = @transform_3, window_bounds = array<i64: 1, 8, 8>}, {transform_indices = @transform_4, window_bounds = array<i64: 1, 8, 32>}, {transform_indices = @transform_5, window_bounds = array<i64: 1, 8, 8>}]} {
    %c0 = arith.constant 0 : index
    %c0_0 = arith.constant 0 : index
    %c0_1 = arith.constant 0 : index
    %0 = vector.load %arg2[%c0, %c0_0, %c0_1] : memref<1x8x32xf32, #tpu.memory_space<vmem>>, vector<1x8x32xf32>
    %1 = vector.shape_cast %0 : vector<1x8x32xf32> to vector<8x32xf32>
    %c0_2 = arith.constant 0 : index
    %c0_3 = arith.constant 0 : index
    %c0_4 = arith.constant 0 : index
    %2 = vector.load %arg3[%c0_2, %c0_3, %c0_4] : memref<1x8x32xf32, #tpu.memory_space<vmem>>, vector<1x8x32xf32>
    %3 = vector.shape_cast %2 : vector<1x8x32xf32> to vector<8x32xf32>
    %c0_5 = arith.constant 0 : index
    %c0_6 = arith.constant 0 : index
    %c0_7 = arith.constant 0 : index
    %4 = vector.load %arg4[%c0_5, %c0_6, %c0_7] : memref<1x8x32xf32, #tpu.memory_space<vmem>>, vector<1x8x32xf32>
    %5 = vector.shape_cast %4 : vector<1x8x32xf32> to vector<8x32xf32>
    %cst = arith.constant 0.176776692 : f32
    %6 = vector.broadcast %cst : f32 to vector<8x32xf32>
    %7 = arith.mulf %1, %6 : vector<8x32xf32>
    %cst_8 = arith.constant dense<0.000000e+00> : vector<8x8xf32>
    %8 = tpu.matmul %7, %3, %cst_8 {dimension_numbers = #tpu.dot_dimension_numbers<[1], [1], [0], [0], [0, 0, 1, 0], [], []>} : vector<8x32xf32>, vector<8x32xf32>, vector<8x8xf32> -> vector<8x8xf32>
    %c0_9 = arith.constant 0 : index
    %c0_10 = arith.constant 0 : index
    %c0_11 = arith.constant 0 : index
    %9 = vector.load %arg5[%c0_9, %c0_10, %c0_11] : memref<1x8x8xi8, #tpu.memory_space<vmem>>, vector<1x8x8xi8>
    %10 = vector.shape_cast %9 : vector<1x8x8xi8> to vector<8x8xi8>
    %c0_i8 = arith.constant 0 : i8
    %11 = vector.broadcast %c0_i8 : i8 to vector<8x8xi8>
    %12 = arith.cmpi ne, %10, %11 : vector<8x8xi8>
    %cst_12 = arith.constant 0xFF800000 : f32
    %13 = vector.broadcast %cst_12 : f32 to vector<8x8xf32>
    %14 = arith.select %12, %13, %8 : vector<8x8xi1>, vector<8x8xf32>
    %cst_13 = arith.constant dense<0xFF800000> : vector<8xf32>
    %15 = vector.multi_reduction <maximumf>, %14, %cst_13 [1] : vector<8x8xf32> to vector<8xf32>
    %16 = vector.shape_cast %15 : vector<8xf32> to vector<8x1xf32>
    %17 = vector.broadcast %16 : vector<8x1xf32> to vector<8x8xf32>
    %18 = arith.subf %14, %17 : vector<8x8xf32>
    %19 = math.exp %18 : vector<8x8xf32>
    %cst_14 = arith.constant dense<0.000000e+00> : vector<8xf32>
    %20 = vector.multi_reduction <add>, %19, %cst_14 [1] : vector<8x8xf32> to vector<8xf32>
    %21 = vector.shape_cast %20 : vector<8xf32> to vector<8x1xf32>
    %22 = tpu.reciprocal %21 : vector<8x1xf32> -> vector<8x1xf32>
    %23 = vector.broadcast %22 : vector<8x1xf32> to vector<8x8xf32>
    %24 = arith.mulf %19, %23 : vector<8x8xf32>
    %cst_15 = arith.constant dense<0.000000e+00> : vector<8x32xf32>
    %25 = tpu.matmul %24, %5, %cst_15 {dimension_numbers = #tpu.dot_dimension_numbers<[1], [0], [0], [1], [0, 0, 1, 1], [], []>} : vector<8x8xf32>, vector<8x32xf32>, vector<8x32xf32> -> vector<8x32xf32>
    %c0_16 = arith.constant 0 : index
    %c0_17 = arith.constant 0 : index
    %c0_18 = arith.constant 0 : index
    %26 = vector.load %arg6[%c0_16, %c0_17, %c0_18] : memref<1x8x32xf32, #tpu.memory_space<vmem>>, vector<1x8x32xf32>
    %27 = vector.shape_cast %26 : vector<1x8x32xf32> to vector<8x32xf32>
    %28 = vector.shape_cast %25 : vector<8x32xf32> to vector<1x8x32xf32>
    tpu.vector_store %arg6[%c0_16, %c0_17, %c0_18], %28 {strides = array<i32>} : memref<1x8x32xf32, #tpu.memory_space<vmem>>, vector<1x8x32xf32>,
    %c0_19 = arith.constant 0 : index
    %c0_20 = arith.constant 0 : index
    %c0_21 = arith.constant 0 : index
    %29 = vector.load %arg7[%c0_19, %c0_20, %c0_21] : memref<1x8x8xf32, #tpu.memory_space<vmem>>, vector<1x8x8xf32>
    %30 = vector.shape_cast %29 : vector<1x8x8xf32> to vector<8x8xf32>
    %31 = vector.shape_cast %24 : vector<8x8xf32> to vector<1x8x8xf32>
    tpu.vector_store %arg7[%c0_19, %c0_20, %c0_21], %31 {strides = array<i32>} : memref<1x8x8xf32, #tpu.memory_space<vmem>>, vector<1x8x8xf32>,
    return
  }
  func.func @transform_0(%arg0: i32, %arg1: i32) -> (i32, i32, i32) {
    %c0_i32 = arith.constant 0 : i32
    %c0_i32_0 = arith.constant 0 : i32
    return %arg0, %arg1, %c0_i32 : i32, i32, i32
  }
  func.func @transform_1(%arg0: i32, %arg1: i32) -> (i32, i32, i32) {
    %c0_i32 = arith.constant 0 : i32
    %c0_i32_0 = arith.constant 0 : i32
    %c0_i32_1 = arith.constant 0 : i32
    return %arg0, %c0_i32, %c0_i32_0 : i32, i32, i32
  }
  func.func @transform_2(%arg0: i32, %arg1: i32) -> (i32, i32, i32) {
    %c0_i32 = arith.constant 0 : i32
    %c0_i32_0 = arith.constant 0 : i32
    %c0_i32_1 = arith.constant 0 : i32
    return %arg0, %c0_i32, %c0_i32_0 : i32, i32, i32
  }
  func.func @transform_3(%arg0: i32, %arg1: i32) -> (i32, i32, i32) {
    %c0_i32 = arith.constant 0 : i32
    %c0_i32_0 = arith.constant 0 : i32
    return %arg0, %arg1, %c0_i32 : i32, i32, i32
  }
  func.func @transform_4(%arg0: i32, %arg1: i32) -> (i32, i32, i32) {
    %c0_i32 = arith.constant 0 : i32
    %c0_i32_0 = arith.constant 0 : i32
    return %arg0, %arg1, %c0_i32 : i32, i32, i32
  }
  func.func @transform_5(%arg0: i32, %arg1: i32) -> (i32, i32, i32) {
    %c0_i32 = arith.constant 0 : i32
    %c0_i32_0 = arith.constant 0 : i32
    return %arg0, %arg1, %c0_i32 : i32, i32, i32
  }
}

</mosaic_0001>

<bundles_post_ra>
// kernel: tpu_custom_call.1
= control target key start
LH: loop header
LB: loop body
LE: loop exit
PB: predicated region body
PF: predicated region fallthrough
CT: control target
= control target key end

     0   :  { %s1284_s0 = inlined_call_operand.hbm [shape: f32[2,8,32], index: 0, kind: input, shape index: {}]   ;;  %s1285_s1 = inlined_call_operand.hbm [shape: f32[2,8,32], index: 1, kind: input, shape index: {}]   ;;  %s1286_s2 = inlined_call_operand.hbm [shape: f32[2,8,32], index: 2, kind: input, shape index: {}]   ;;  %s1287_s3 = inlined_call_operand.hbm [shape: s8[2,8,8], index: 3, kind: input, shape index: {}]   ;;  %s1288_s4 = inlined_call_operand.hbm [shape: f32[2,8,32], index: 4, kind: output, shape index: {0}]   ;;  %s1289_s5 = inlined_call_operand.hbm [shape: f32[2,8,8], index: 5, kind: output, shape index: {1}]  }
   0x1   :  { %1295 = sst [smem:[#allocation23_spill]] %s1284_s0 }
   0x2   :  { %1296 = sst [smem:[#allocation24_spill]] %s1285_s1 }
   0x3   :  { %11 = vsyncpa [#allocation3], 0 }
   0x4   :  { %13 = vsyncpa [#allocation3 + $0x1], 0 }
   0x5   :  { %14 = vsyncpa [#allocation6], 0 }
   0x6   :  { %16 = vsyncpa [#allocation6 + $0x1], 0 }
   0x7   :  { %17 = vsyncpa [#allocation9], 0 }
   0x8   :  { %19 = vsyncpa [#allocation9 + $0x1], 0 }
   0x9   :  { %20 = vsyncpa [#allocation4], 0 }
   0xa   :  { %22 = vsyncpa [#allocation4 + $0x1], 0 }
   0xb   :  { %23 = vsyncpa [#allocation12], 0 }
   0xc   :  { %25 = vsyncpa [#allocation12 + $0x1], 0  ;;  %s1086_s18 = smov 0   ;;  %s1088_s19 = smov 0  }
   0xd   :  { %s1090_s20 = smov 0   ;;  %s1092_s21 = smov 0  }
   0xe   :  { %s1094_s22 = smov 0   ;;  %s1096_s23 = smov 0  }
   0xf LB: > { %1297 = sst [smem:[#allocation18_spill]] %s1041_s20  ;;  %s1117_s24 = sadd.s32 4294967295, %s1053_s23   ;;  %s1053_s23 = sphi %s1096_s23, %s31_s23   ;;  %s1049_s22 = sphi %s1094_s22, %s1318_s22   ;;  %s1045_s21 = sphi %s1092_s21, %s1317_s21   ;;  %s1041_s20 = sphi %s1090_s20, %s1313_s20   ;;  %s1037_s19 = sphi %s1088_s19, %s1316_s19   ;;  %s1033_s18 = sphi %s1086_s18, %s1315_s18  }
  0x10   : > { %1298 = sst [smem:[#allocation19_spill]] %s1053_s23  ;;  %s697_s25 = sadd.s32 4294967294, %s1053_s23  }
  0x11   : > { %s43_s26 = sadd.s32 1, %s1049_s22  ;;  %s52_s27 = sadd.s32 1, %s1041_s20 }
  0x12   : > { %p45_p0 = scmp.ge.s32.totalorder %s43_s26, 2  ;;  %p59_p1 = scmp.ne.s32.totalorder %s1041_s20, %s1037_s19 }
  0x13   : > { %p60_p2 = scmp.eq.s32.totalorder %s1053_s23, 0  ;;  %p65_p3 = scmp.ne.s32.totalorder %s1037_s19, %s1033_s18 }
  0x14   : > { %s1320_s26 = smov (%p45_p0, %s43_s26), 0  ;;  %p66_p5 = scmp.eq.s32.totalorder %s1117_s24, 0 }
  0x15   : > { %1299 = sst [smem:[#allocation20_spill]] %s1320_s26  ;;  %p1129_p4 = por %p60_p2, %p59_p1 }
  0x16   : > { %s47_s29 = ssub.s32 %s1049_s22, %s1320_s26  ;;  %p171_p6 = scmp.eq.s32.totalorder %s1117_s24, 1 }
  0x17   : > { %p50_p7 = scmp.eq.s32.totalorder %s47_s29, 0  ;;  %p1137_p8 = por %p66_p5, %p65_p3 }
  0x18   : > { %p1141_p9 = por %p171_p6, %p59_p1  ;;  %p177_p10 = scmp.eq.s32.totalorder %s697_s25, 1 }
  0x19   : > { %s1146_s7 = scalar_select %p50_p7, %s1041_s20, %s52_s27  }
  0x1a   : > { %p1148_p11 = por %p177_p10, %p65_p3  ;;  %p699_p12 = scmp.ge.s32.totalorder %s1053_s23, 2 }
  0x1b   : > { %1303 = sst [smem:[#allocation21_spill]] %s1146_s7  ;;  %p756_p13 = scmp.lt.s32.totalorder %s1053_s23, 2 }
  0x1c   : > { %s1304_s8 = scalar_select %p1148_p11, 1, 0 }
  0x1d   : > { %s1155_s9 = sand.u32 1, %s1041_s20   ;;  %s701_s11 = sshll.u32 %s1049_s22, 3 }
  0x1e   : > { %1305 = sst [smem:[#allocation22_spill]] %s1304_s8  ;;  %s700_s10 = sshll.u32 %s1155_s9, 3 }
  0x1f   : > { %p1161_p0 = pnand %p756_p13, %p1129_p4  ;;  %s245_s13 = sand.u32 1, %s1053_s23  }
  0x20   : > { %s1307_s1 = sld [smem:[#allocation24_spill]]  ;;  %s249_s25 = scalar_lea.vmem [#allocation5], %s700_s10 }
  0x21   : > { %s257_s27 = sshll.u32 %s249_s25, 4  ;;  %s246_s29 = scalar_lea.sflag [#allocation6], %s245_s13  ;;  %s258_s27 = int_to_ptr.vmem [resolvable:$true] %s257_s27 }
  0x22   : > { %p708_p1 = scmp.ge.s32.totalorder %s1053_s23, 1  ;;  %p301_p2 = scmp.lt.s32.totalorder %s1053_s23, 3 }
  0x23   : > { %s1309_s0 = sld [smem:[#allocation23_spill]]  ;;  %s229_s25 = scalar_lea.vmem [#allocation2], %s700_s10 }
  0x24   : > { %p1173_p3 = pnand %p708_p1, %p301_p2  ;;  %s226_s13 = scalar_lea.sflag [#allocation3], %s1155_s9 }
  0x25   : > { %s272_s7 = scalar_lea.hbm %s1286_s2, %s701_s11  ;;  %s268_s23 = scalar_lea.vmem [#allocation7], %s700_s10 }
  0x26   : > { %s253_s16 = scalar_lea.hbm %s1307_s1, %s701_s11  ;;  %s238_s1 = sshll.u32 %s229_s25, 4  ;;  %s239_s1 = int_to_ptr.vmem [resolvable:$true] %s238_s1 }
  0x27   : > { %s255_s17 = sshll.u32 %s253_s16, 4  ;;  %s274_s20 = sshll.u32 %s272_s7, 4  ;;  %s256_s17 = int_to_ptr.hbm [resolvable:$true] %s255_s17  ;;  %s275_s20 = int_to_ptr.hbm [resolvable:$true] %s274_s20 }
  0x28   : > { %742 = dma.hbm_to_vmem [thread:$0]  (!%p1161_p0), %s256_s17, 128, %s258_s27, %s246_s29  }
  0x29   : > { %s234_s15 = scalar_lea.hbm %s1309_s0, %s701_s11  ;;  %s276_s26 = sshll.u32 %s268_s23, 4  ;;  %s277_s26 = int_to_ptr.vmem [resolvable:$true] %s276_s26 }
  0x2a   : > { %s236_s16 = sshll.u32 %s234_s15, 4  ;;  %s706_s14 = sshll.u32 %s1155_s9, 1  ;;  %s237_s16 = int_to_ptr.hbm [resolvable:$true] %s236_s16 }
  0x2b   : > { %739 = dma.hbm_to_vmem [thread:$0]  (!%p1161_p0), %s237_s16, 128, %s239_s1, %s226_s13  }
  0x2c   : > { %745 = dma.hbm_to_vmem [thread:$0]  (!%p1161_p0), %s275_s20, 128, %s277_s26, %s246_s29  }
  0x2d   : > { %s707_s15 = sshll.u32 %s1049_s22, 1  ;;  %s287_s1 = scalar_lea.vmem [#allocation8], %s706_s14 }
  0x2e   : > { %s292_s8 = scalar_lea.hbm %s1287_s3, %s707_s15  ;;  %s296_s16 = sshll.u32 %s287_s1, 4  ;;  %s297_s16 = int_to_ptr.vmem [resolvable:$true] %s296_s16 }
  0x2f   : > { %s294_s13 = sshll.u32 %s292_s8, 4  ;;  %s284_s11 = scalar_lea.sflag [#allocation9], %s1155_s9  ;;  %s295_s13 = int_to_ptr.hbm [resolvable:$true] %s294_s13 }
  0x30   : > { %748 = dma.hbm_to_vmem [thread:$0]  (!%p1161_p0), %s295_s13, 32, %s297_s16, %s284_s11  }
  0x31   : > { %305 = sbr.rel (%p1173_p3) target bundleno = 585 (0x249), region = 36  ;;  %s1199_s20 = sand.u32 (!%p1173_p3), 1, %s1037_s19  }
  0x32   : > { %s1202_s23 = sshll.u32 (!%p1173_p3), %s1199_s20, 3  ;;  %s308_s0 = scalar_lea.sflag (!%p1173_p3), [#allocation3], %s1199_s20 }
  0x33   : > { %s311_s7 = scalar_lea.vmem (!%p1173_p3), [#allocation2], %s1202_s23 }
  0x36   : > { %1012 = dma.done.wait (%p1137_p8), %s308_s0, 128  }
  0x37   : > { %1014 = vsyncadd (%p1137_p8), %s308_s0, 4294967168  ;;  %s317_s8 = sand.u32 1, %s1117_s24   ;;  %s321_s10 = scalar_lea.vmem [#allocation5], %s1202_s23 }
  0x38   : > { %s318_s9 = scalar_lea.sflag [#allocation6], %s317_s8 }
  0x39   : > { %1016 = dma.done.wait (%p1137_p8), %s318_s9, 256  }
  0x3a   : > { %1018 = vsyncadd (%p1137_p8), %s318_s9, 4294967040  ;;  %s712_s12 = sshll.u32 %s1199_s20, 1  ;;  %s331_s29 = scalar_lea.vmem [#allocation7], %s1202_s23 }
  0x3b   : > { %s338_s28 = scalar_lea.sflag [#allocation9], %s1199_s20  ;;  %s341_s17 = scalar_lea.vmem [#allocation8], %s712_s12 }
  0x3c   : > { %1020 = dma.done.wait (%p1137_p8), %s338_s28, 32  }
  0x3d   : > { %1022 = vsyncadd (%p1137_p8), %s338_s28, 4294967264  ;;  %vm395_vm0 = vcmask 261120   ;;  %v392_v0 = vld [vmem:[%s321_s10] sm:$0xff]  ;;  %v391_v1 = vld [vmem:[%s311_s7] sm:$0xff]  ;;  %v1055_v4 = vmov 0   ;;  %vm428_vm3 = vcmask 64512  }
  0x3e   : > { %715 = vmatpush.xpose.msk.msra.mxu0 %vm395_vm0, %v392_v0  ;;  %v394_v2 = vmul.f32 0.17677669, %v391_v1  ;;  %v422_v3 = vld [vmem:[%s341_s17] sm:$0x3]  ;;  %v393_v15 = vld [vmem:[%s331_s29] sm:$0xff]  ;;  %s720_s24 = sshll.u32 %s1045_s21, 3 }
  0x3f   : > { %vm423_vm1 = vnez %v422_v3  ;;  %471 = vmatpush.msra.mxu1 %v393_v15  ;;  %s510_s26 = scalar_lea.hbm %s1289_s5, %s720_s24  ;;  %s388_s14 = scalar_lea.vmem [#allocation11], %s1202_s23 }
  0x40   : > { %v424_v5 = vsel %vm423_vm1, 16843009, %v1055_v4  ;;  %s512_s15 = sshll.u32 %s388_s14, 4  ;;  %s514_s25 = sshll.u32 %s510_s26, 4  ;;  %s513_s15 = int_to_ptr.vmem [resolvable:$true] %s512_s15  ;;  %s515_s25 = int_to_ptr.hbm [resolvable:$true] %s514_s25 }
  0x41   : > { %716 = vmatmul.msk.f32.vlgmr.msra.gmra.mxu0 %vm395_vm0, %v394_v2  ;;  %v425_v6 = vunpack.c.0.s8 %v424_v5  ;;  %s484_s1 = scalar_lea.sflag [#allocation12], %s1199_s20  ;;  %s945_s21 = sshra.s32 %s515_s25, 4  ;;  %s946_s21 = int_to_ptr.hbm [resolvable:$true] %s945_s21 }
  0x42   : > { %s947_s16 = scalar_lea.hbm %s946_s21, 8  ;;  %s951_s0 = scalar_lea.hbm %s1289_s5, 16 }
  0x43   : > { %vm426_vm2 = vcmp.ne.s32.totalorder %v425_v6, 0  ;;  %p948_p4 = scmp.ne.s32.totalorder %s946_s21, %s947_s16  ;;  %p952_p7 = scmp.lt.s32.totalorder %s946_s21, %s1289_s5 }
  0x44   : > { %p953_p8 = scmp.lt.s32.totalorder %s951_s0, %s947_s16 }
  0x45   : > { %p949_p5 = pnand %p948_p4, %p1141_p9 }
  0x46   : > { %p954_p10 = por %p953_p8, %p952_p7 }
  0x47   : > { %p950_p6 = pneg %p949_p5 }
  0x49   : > { %p955_p13 = pnand %p954_p10, %p950_p6 }
  0xbe   : > { %v419_v7 = vpop.f32.mrf.mxu0 }
  0xbf   : > { %v427_v8 = vsel %vm426_vm2, -inf, %v419_v7 }
  0xc0   : > { %v429_v9 = vsel %vm428_vm3, %v427_v8, -inf }
  0xc1   : > { %430 = vmax.xlane.f32.xlu0 %v429_v9 }
 0x134   : > { %v431_v10 = vpop.xlane.xlu0 %430 }
 0x135   : > { %v432_v11 = vsub.f32 %v427_v8, %v431_v10 }
 0x137   : > { %v433_v12 = vmul.f32 1.442695, %v432_v11 }
 0x139   : > { %807 = vpow2.f32 %v433_v12 }
 0x13f   : > { %v808_v13 = vpop.eup %807 }
 0x140   : > { %v435_v14 = vsel %vm428_vm3, %v808_v13, 0.0 }
 0x141   : > { %436 = vadd.xlane.f32.xlu0 %v435_v14 }
 0x1b4   : > { %v437_v16 = vpop.xlane.xlu0 %436 }
 0x1b5   : > { %809 = vrcp.f32 %v437_v16  ;;  %v449_v20 = vand.u32 2147483648, %v437_v16  ;;  %v447_v22 = vand.u32 2147483647, %v437_v16  ;;  %vm443_vm5 = vweird.f32 %v437_v16 }
 0x1b7   : > { %v450_v24 = vor.u32 1.1754944e-38, %v449_v20  ;;  %vm448_vm7 = vcmp.eq.f32.partialorder %v447_v22, 8.507059e+37 }
 0x1bb   : > { %v810_v17 = vpop.eup %809 }
 0x1bc   : > { %v439_v18 = vmul.f32 %v810_v17, %v437_v16  ;;  %vm444_vm4 = vweird.f32 %v810_v17 }
 0x1bd   : > { %vm445_vm6 = vmor %vm443_vm5, %vm444_vm4 }
 0x1be   : > { %v440_v19 = vsub.f32 1.0, %v439_v18 }
 0x1c0   : > { %v441_v21 = vmul.f32 %v810_v17, %v440_v19 }
 0x1c2   : > { %v442_v23 = vadd.f32 %v810_v17, %v441_v21 }
 0x1c4   : > { %v446_v25 = vsel %vm445_vm6, %v810_v17, %v442_v23 }
 0x1c5   : > { %v451_v26 = vsel %vm448_vm7, %v450_v24, %v446_v25 }
 0x1c6   : > { %v452_v27 = vmul.f32 %v808_v13, %v451_v26 }
 0x1c8   : > { %717 = vmatmul.msk.f32.vlgmr.msra.gmra.mxu1 %vm428_vm3, %v452_v27  ;;  %477 = vst.msk [vmem:[%s388_s14] sm:$0xff] %vm428_vm3, %v452_v27 }
 0x1c9   : > { %958 = shalt.err (!%p955_p13)
}
 0x1ca   : > { %733 = dma.vmem_to_hbm [thread:$0]  (%p1141_p9), %s513_s15, 128, %s515_s25, %s484_s1  }
 0x1cb   : > { %s495_s12 = scalar_lea.hbm %s1288_s4, %s720_s24  ;;  %s381_s29 = scalar_lea.vmem [#allocation10], %s1202_s23 }
 0x1cc   : > { %s497_s28 = sshll.u32 %s381_s29, 4  ;;  %s499_s17 = sshll.u32 %s495_s12, 4  ;;  %s498_s28 = int_to_ptr.vmem [resolvable:$true] %s497_s28  ;;  %s500_s17 = int_to_ptr.hbm [resolvable:$true] %s499_s17 }
 0x1cd   : > { %s479_s30 = scalar_lea.sflag [#allocation4], %s1199_s20  ;;  %s973_s27 = sshra.s32 %s500_s17, 4  ;;  %s974_s27 = int_to_ptr.hbm [resolvable:$true] %s973_s27 }
 0x1ce   : > { %s975_s26 = scalar_lea.hbm %s974_s27, 8  ;;  %s979_s24 = scalar_lea.hbm %s1288_s4, 16 }
 0x1cf   : > { %p976_p0 = scmp.ne.s32.totalorder %s974_s27, %s975_s26  ;;  %p980_p3 = scmp.lt.s32.totalorder %s974_s27, %s1288_s4 }
 0x1d0   : > { %p981_p4 = scmp.lt.s32.totalorder %s979_s24, %s975_s26 }
 0x1d1   : > { %p977_p1 = pnand %p976_p0, %p1141_p9 }
 0x1d2   : > { %p982_p5 = por %p981_p4, %p980_p3 }
 0x1d3   : > { %p978_p2 = pneg %p977_p1 }
 0x1d5   : > { %p983_p6 = pnand %p982_p5, %p978_p2 }
 0x245   : > { %v473_v28 = vpop.f32.mrf.mxu1 }
 0x246   : > { %476 = vst.msk [vmem:[%s381_s29] sm:$0xff] %vm395_vm0, %v473_v28 }
 0x247   : > { %986 = shalt.err (!%p983_p6)
}
 0x248   : > { %732 = dma.vmem_to_hbm [thread:$0]  (%p1141_p9), %s498_s28, 128, %s500_s17, %s479_s30  }
 0x249 PF: > { %s1311_s1 = sld [smem:[#allocation19_spill]]  ;;  %s526_s21 = sand.u32 1, %s1033_s18  }
 0x24a   : > { %p750_p7 = pnand %p699_p12, %p1148_p11  ;;  %s527_s16 = scalar_lea.sflag [#allocation4], %s526_s21 }
 0x24c   : > { %p751_p8 = pneg %p750_p7 }
 0x24e   : > { %1024 = dma.done.wait (%p751_p8), %s527_s16, 128  }
 0x24f   : > { %1026 = vsyncadd (%p751_p8), %s527_s16, 4294967168  ;;  %s537_s13 = scalar_lea.sflag [#allocation12], %s526_s21 }
 0x250   : > { %1028 = dma.done.wait (%p751_p8), %s537_s13, 128  }
 0x251   : > { %1030 = vsyncadd (%p751_p8), %s537_s13, 4294967168  ;;  %s31_s23 = sadd.s32 1, %s1311_s1   ;;  %s1312_s6 = sld [smem:[#allocation18_spill]] }
 0x252   : > { %p28_p10 = scmp.ge.s32.totalorder %s31_s23, 4   ;;  %s1313_s20 = sld [smem:[#allocation21_spill]] }
 0x253   : > { %s1314_s11 = sld [smem:[#allocation20_spill]]  ;;  %s1315_s18 = smov %s1037_s19 }
 0x254   : > { %s1317_s21 = smov %s1049_s22 }
 0x255   :  { %30 = sbr.rel (!%p28_p10) target bundleno = 15 (0xf), region = 135 }
 0x257   : > { %s1316_s19 = smov %s1312_s6 }
 0x259   : > { %s1318_s22 = smov %s1314_s11 }
 0x25a   :  { %543 = vsyncpa [#allocation3], 1 }
 0x25b   :  { %545 = vsyncpa [#allocation3 + $0x1], 1 }
 0x25c   :  { %546 = vsyncpa [#allocation6], 1 }
 0x25d   :  { %548 = vsyncpa [#allocation6 + $0x1], 1 }
 0x25e   :  { %549 = vsyncpa [#allocation9], 1 }
 0x25f   :  { %551 = vsyncpa [#allocation9 + $0x1], 1 }
 0x260   :  { %552 = vsyncpa [#allocation4], 1 }
 0x261   :  { %554 = vsyncpa [#allocation4 + $0x1], 1 }
 0x262   :  { %555 = vsyncpa [#allocation12], 1 }
 0x263   :  { %557 = vsyncpa [#allocation12 + $0x1], 1 }

</bundles_post_ra>
